<compile_context>
chip_gen: v7x
topology: tpu7x:2x2x1
jax: 0.10.0
libtpu: 0.0.40
codegen_flags: <defaults>
</compile_context>

<pallas_src>
import jax
import jax.numpy as jnp
from jax.experimental import pallas as pl
from jax.experimental.pallas import tpu as pltpu

ALPHA = 1.6732632423543772
SCALE = 1.0507009873554805

LANE = 128      # vreg lane width
SUBLANE = 8     # f32 sublane width
MAX_TILE_ROWS = 512   # measured sweet spot for mem-bound tiles (v6e); fits v7x VMEM too


def selu_kernel(x_ref, o_ref):
    x = x_ref[...]
    # scale * relu(x)
    pos = SCALE * jnp.maximum(x, 0.0)
    # scale * alpha * elu(-relu(-x)) == scale * alpha * (exp(min(x, 0)) - 1)
    # (clamping before exp avoids overflow; exact for x >= 0 since exp(0)-1 == 0)
    neg = (SCALE * ALPHA) * (jnp.exp(jnp.minimum(x, 0.0)) - 1.0)
    o_ref[...] = (pos + neg).astype(o_ref.dtype)


def selu_pallas(x):
    """Elementwise SELU on an arbitrarily-shaped array via a lane-dense 2D slab."""
    orig_shape = x.shape
    orig_dtype = x.dtype
    n = x.size

    # Rows of 128 lanes needed to hold the flattened input.
    rows_needed = pl.cdiv(n, LANE)
    # Tile rows: multiple of the sublane, capped at MAX_TILE_ROWS.
    tile_rows = min(MAX_TILE_ROWS, ((rows_needed + SUBLANE - 1) // SUBLANE) * SUBLANE)
    tile_rows = max(tile_rows, SUBLANE)
    # Pad row count so the grid tiles it exactly (padded lanes are zeros; harmless).
    rows_padded = ((rows_needed + tile_rows - 1) // tile_rows) * tile_rows
    n_padded = rows_padded * LANE

    flat = jnp.zeros((n_padded,), jnp.float32)
    flat = flat.at[:n].set(x.reshape(-1).astype(jnp.float32))
    x2d = flat.reshape(rows_padded, LANE)

    grid = (rows_padded // tile_rows,)

    out2d = pl.pallas_call(
        selu_kernel,
        out_shape=jax.ShapeDtypeStruct((rows_padded, LANE), jnp.float32),
        grid=grid,
        in_specs=[pl.BlockSpec((tile_rows, LANE), lambda i: (i, 0))],
        out_specs=pl.BlockSpec((tile_rows, LANE), lambda i: (i, 0)),
        compiler_params=pltpu.CompilerParams(
            dimension_semantics=("parallel",),   # megacore sharding on v7x
            vmem_limit_bytes=64 << 20,
        ),
    )(x2d)

    return out2d.reshape(-1)[:n].reshape(orig_shape).astype(orig_dtype)


def selu_reference(x):
    """Pure-JAX reference matching the PyTorch module exactly."""
    x = x.astype(jnp.float32)
    temp1 = SCALE * jnp.maximum(x, 0.0)
    # F.elu(-relu(-x)) with the argument always <= 0  ->  exp(arg) - 1
    temp2 = SCALE * ALPHA * (jnp.exp(jnp.minimum(x, 0.0)) - 1.0)
    return temp1 + temp2


if __name__ == "__main__":
    key = jax.random.PRNGKey(0)
    # Small shape consistent with an elementwise activation module.
    x = jax.random.normal(key, (2, 4, 16, 16), jnp.float32) * 3.0

    out = selu_pallas(x)
    out = jax.block_until_ready(out)

    ref = selu_reference(x)
    assert out.shape == x.shape
    assert jnp.allclose(out, ref, atol=1e-5, rtol=1e-5), "mismatch vs reference"

    print("KERNEL_OK")
</pallas_src>

<mosaic_0001>
module attributes {stable_mosaic.version = 11 : i64} {
  func.func @selu_kernel(%arg0: i32, %arg1: memref<16x128xf32, #tpu.memory_space<vmem>>, %arg2: memref<16x128xf32, #tpu.memory_space<vmem>>) attributes {dimension_semantics = [#tpu.dimension_semantics<parallel>], iteration_bounds = array<i64: 1>, scalar_prefetch = 0 : i64, scratch_operands = 0 : i64, tpu.core_type = #tpu.core_type<tc>, window_params = [{transform_indices = @transform_0, window_bounds = array<i64: 16, 128>}, {transform_indices = @transform_1, window_bounds = array<i64: 16, 128>}]} {
    %c0 = arith.constant 0 : index
    %c0_0 = arith.constant 0 : index
    %0 = vector.load %arg1[%c0, %c0_0] : memref<16x128xf32, #tpu.memory_space<vmem>>, vector<16x128xf32>
    %cst = arith.constant 0.000000e+00 : f32
    %1 = vector.broadcast %cst : f32 to vector<16x128xf32>
    %2 = arith.maximumf %0, %1 : vector<16x128xf32>
    %cst_1 = arith.constant 1.05070102 : f32
    %3 = vector.broadcast %cst_1 : f32 to vector<16x128xf32>
    %4 = arith.mulf %3, %2 : vector<16x128xf32>
    %cst_2 = arith.constant 0.000000e+00 : f32
    %5 = vector.broadcast %cst_2 : f32 to vector<16x128xf32>
    %6 = arith.minimumf %0, %5 : vector<16x128xf32>
    %7 = math.exp %6 : vector<16x128xf32>
    %cst_3 = arith.constant 1.000000e+00 : f32
    %8 = vector.broadcast %cst_3 : f32 to vector<16x128xf32>
    %9 = arith.subf %7, %8 : vector<16x128xf32>
    %cst_4 = arith.constant 1.75809932 : f32
    %10 = vector.broadcast %cst_4 : f32 to vector<16x128xf32>
    %11 = arith.mulf %10, %9 : vector<16x128xf32>
    %12 = arith.addf %4, %11 : vector<16x128xf32>
    %c0_5 = arith.constant 0 : index
    %c0_6 = arith.constant 0 : index
    %13 = vector.load %arg2[%c0_5, %c0_6] : memref<16x128xf32, #tpu.memory_space<vmem>>, vector<16x128xf32>
    tpu.vector_store %arg2[%c0_5, %c0_6], %12 {strides = array<i32>} : memref<16x128xf32, #tpu.memory_space<vmem>>, vector<16x128xf32>,
    return
  }
  func.func @transform_0(%arg0: i32) -> (i32, i32) {
    %c0_i32 = arith.constant 0 : i32
    %c0_i32_0 = arith.constant 0 : i32
    return %arg0, %c0_i32 : i32, i32
  }
  func.func @transform_1(%arg0: i32) -> (i32, i32) {
    %c0_i32 = arith.constant 0 : i32
    %c0_i32_0 = arith.constant 0 : i32
    return %arg0, %c0_i32 : i32, i32
  }
}

</mosaic_0001>

<bundles_post_ra>
// kernel: tpu_custom_call.1
= control target key start
LH: loop header
LB: loop body
LE: loop exit
PB: predicated region body
PF: predicated region fallthrough
CT: control target
= control target key end

     0   :  { %6 = vsyncpa [#allocation3], 0  ;;  %s162_s0 = inlined_call_operand.hbm [shape: f32[16,128], index: 0, kind: input, shape index: {}]   ;;  %s163_s1 = inlined_call_operand.hbm [shape: f32[16,128], index: 1, kind: output, shape index: {}]  }
   0x1   :  { %7 = vsyncpa [#allocation4], 0  ;;  %s118_s6 = smov [#allocation2]   ;;  %s70_s10 = scalar_lea.hbm %s162_s0, 256 }
   0x2   :  { %s13_s7 = sshll.u32 %s118_s6, 4  ;;  %p71_p0 = scmp.ne.s32.totalorder %s162_s0, %s70_s10  ;;  %s14_s7 = int_to_ptr.vmem [resolvable:$true] %s13_s7 }
   0x3   :  { %p74_p1 = scmp.lt.u32.totalorder %s70_s10, %s162_s0 }
   0x5   :  { %p76_p2 = pnand %p74_p1, %p71_p0 }
   0x7   :  { %79 = shalt.err (!%p76_p2)
}
   0x8   :  { %s80_s15 = scalar_lea.vmem %s14_s7, 256  ;;  %p85_p4 = scmp.lt.s32.totalorder %s14_s7, %s14_s7 }
   0x9   :  { %p81_p3 = scmp.ne.s32.totalorder %s14_s7, %s80_s15  ;;  %p86_p5 = scmp.lt.s32.totalorder %s80_s15, %s80_s15 }
   0xb   :  { %p87_p6 = por %p86_p5, %p85_p4 }
   0xd   :  { %p88_p7 = pnand %p87_p6, %p81_p3 }
   0xf   :  { %91 = shalt.err (!%p88_p7)
}
  0x10   :  { %s119_s16 = smov 128   ;;  %s120_s17 = smov 8  }
  0x11   :  { %19 = dma.hbm_to_vmem [thread:$0]  %s162_s0, 256, %s14_s7, [#allocation3], %s119_s16, %s119_s16, %s120_s17  }
  0x12   :  { %114 = dma.done.wait [#allocation3], 256  }
  0x13   :  { %115 = vsyncadd [#allocation3], 4294967040  ;;  %v23_v0 = vld [vmem:[#allocation2] sm:$0xff]  ;;  %v24_v1 = vld [vmem:[#allocation2 + $0x8] sm:$0xff]  ;;  %s121_s0 = smov [#allocation5]  }
  0x14   :  { %v29_v2 = vmin.f32 %v23_v0, 0.0  ;;  %v30_v3 = vmin.f32 %v24_v1, 0.0  ;;  %v25_v6 = vmax.f32 %v23_v0, 0.0  ;;  %v26_v7 = vmax.f32 %v24_v1, 0.0  ;;  %s48_s20 = sshll.u32 %s121_s0, 4  ;;  %s49_s20 = int_to_ptr.vmem [resolvable:$true] %s48_s20 }
  0x15   :  { %s92_s21 = scalar_lea.vmem %s49_s20, 256  ;;  %p97_p9 = scmp.lt.s32.totalorder %s49_s20, %s49_s20 }
  0x16   :  { %v31_v4 = vmul.f32 1.442695, %v29_v2  ;;  %v33_v5 = vmul.f32 1.442695, %v30_v3  ;;  %v27_v10 = vmul.f32 1.050701, %v25_v6  ;;  %p93_p8 = scmp.ne.s32.totalorder %s49_s20, %s92_s21  ;;  %p98_p10 = scmp.lt.s32.totalorder %s92_s21, %s92_s21 }
  0x17   :  { %v28_v12 = vmul.f32 1.050701, %v26_v7 }
  0x18   :  { %66 = vpow2.f32 %v31_v4  ;;  %p99_p11 = por %p98_p10, %p97_p9 }
  0x19   :  { %68 = vpow2.f32 %v33_v5 }
  0x1a   :  { %p100_p12 = pnand %p99_p11, %p93_p8 }
  0x22   :  { %v67_v8 = vpop.eup %66 }
  0x23   :  { %v69_v9 = vpop.eup %68  ;;  %v60_v11 = vadd.f32 -1.0, %v67_v8 }
  0x24   :  { %v61_v13 = vadd.f32 -1.0, %v69_v9 }
  0x25   :  { %v37_v14 = vmul.f32 1.7580993, %v60_v11 }
  0x26   :  { %v38_v15 = vmul.f32 1.7580993, %v61_v13 }
  0x27   :  { %v39_v16 = vadd.f32 %v37_v14, %v27_v10 }
  0x28   :  { %v40_v17 = vadd.f32 %v38_v15, %v28_v12 }
  0x29   :  { %41 = vst [vmem:[#allocation5] sm:$0xff] %v39_v16 }
  0x2a   :  { %42 = vst [vmem:[#allocation5 + $0x8] sm:$0xff] %v40_v17 }
  0x2b   :  { %103 = shalt.err (!%p100_p12)
}
  0x2c   :  { %s104_s24 = scalar_lea.hbm %s163_s1, 256 }
  0x2d   :  { %p105_p13 = scmp.ne.s32.totalorder %s163_s1, %s104_s24  ;;  %p108_p0 = scmp.lt.u32.totalorder %s104_s24, %s163_s1 }
  0x2f   :  { %p110_p1 = pnand %p108_p0, %p105_p13 }
  0x31   :  { %113 = shalt.err (!%p110_p1)
}
  0x32   :  { %54 = dma.vmem_to_hbm [thread:$0]  %s49_s20, 256, %s163_s1, [#allocation4], %s119_s16, %s119_s16, %s120_s17  }
  0x33   :  { %116 = dma.done.wait [#allocation4], 256  }
  0x34   :  { %117 = vsyncadd [#allocation4], 4294967040 }
  0x35   :  { %58 = vsyncpa [#allocation3], 1 }
  0x36   :  { %59 = vsyncpa [#allocation4], 1 }

</bundles_post_ra>
